<compile_context>
chip_gen: v5e
topology: v5e:2x2
jax: 0.10.0
libtpu: 0.0.40
codegen_flags: <defaults>
</compile_context>

<pallas_src>
import functools

import jax
import jax.numpy as jnp
from jax.experimental import pallas as pl
from jax.experimental.pallas import tpu as pltpu

_VMEM_BUDGET_BYTES = 12 * 1024 * 1024   # fits v5e's 16 MiB scoped default, << v7x 64 MiB physical
_TARGET_STEP_BYTES = 1 * 1024 * 1024    # aim for >= ~1 MiB combined I/O per grid step
_MAX_BATCH_BLOCK = 8                    # cap the static per-step image unroll


def _round_up(x, m):
    return ((x + m - 1) // m) * m


def _plan_tiling(N, HW, c_in, c_outs, in_itemsize, out_itemsize, max_tile):
    """Pick (nb, t_hw, hw_pad): batch block, lane-dense spatial tile, padded HW."""
    c_last = c_outs[-1]

    t_hw = min(_round_up(HW, 128), _round_up(max_tile, 128))
    hw_pad = _round_up(HW, t_hw)
    n_hw = hw_pad // t_hw

    # v7x: keep at least 2 parallel grid steps when the problem allows it.
    if N * n_hw < 2 and hw_pad >= 256:
        t_hw = _round_up(hw_pad // 2, 128)
        hw_pad = _round_up(HW, t_hw)
        n_hw = hw_pad // t_hw

    def vmem_bytes(nb, t):
        io = 2 * nb * t * (c_in * in_itemsize + c_last * out_itemsize)  # double-buffered I/O
        live = nb * t * 4 * (c_in + max(c_outs))                        # f32 on-chip intermediates
        return io + live

    # Shrink the spatial tile if even a single-image step would bust the VMEM budget.
    while t_hw > 128 and vmem_bytes(1, t_hw) > _VMEM_BUDGET_BYTES:
        t_hw = _round_up(t_hw // 2, 128)
    hw_pad = _round_up(HW, t_hw)
    n_hw = hw_pad // t_hw

    def step_bytes(nb, t):
        return nb * t * (c_in * in_itemsize + c_last * out_itemsize)

    nb = 1
    for cand in range(1, min(N, _MAX_BATCH_BLOCK) + 1):
        if N % cand:
            continue
        if (N // cand) * n_hw < 2 and N * n_hw >= 2:
            continue                      # never collapse below 2 parallel steps if avoidable
        if vmem_bytes(cand, t_hw) > _VMEM_BUDGET_BYTES:
            continue
        nb = cand
        if step_bytes(cand, t_hw) >= _TARGET_STEP_BYTES:
            break
    return nb, t_hw, hw_pad


def _make_fused_kernel(n_stages, nb, out_dtype):
    def kernel(x_ref, *refs):
        # refs = (w_0..w_{n-1}, shift_0..shift_{n-1}, o_ref)
        w_refs = refs[:n_stages]
        s_refs = refs[n_stages:2 * n_stages]
        o_ref = refs[2 * n_stages]
        for b in range(nb):                                   # static unroll over images in block
            h = x_ref[b]                                      # (C_in, t_hw), lane-dense
            for i in range(n_stages):
                # (Cout, Cin) @ (Cin, t_hw) on the MXU, f32 accumulate.
                y = jnp.dot(w_refs[i][...], h, preferred_element_type=jnp.float32)
                h = y + s_refs[i][...]                        # (Cout, 1) affine; stays f32 on-chip
            o_ref[b] = h.astype(out_dtype)
    return kernel


@functools.partial(jax.jit, static_argnames=("out_dtype", "max_tile"))
def conv_series_forward(x_nchw, params_list, *, out_dtype=None, max_tile=8192):
    """x_nchw: (N, C, H, W) -> (N, C_last, H, W) in out_dtype (default: input dtype)."""
    N, C, H, W = x_nchw.shape
    HW = H * W
    n_stages = len(params_list)
    c_outs = [int(p["w_folded"].shape[0]) for p in params_list]
    c_last = c_outs[-1]
    out_dtype = jnp.dtype(x_nchw.dtype if out_dtype is None else out_dtype)

    nb, t_hw, hw_pad = _plan_tiling(
        N, HW, C, c_outs,
        in_itemsize=jnp.dtype(x_nchw.dtype).itemsize,
        out_itemsize=out_dtype.itemsize,
        max_tile=max_tile)

    # Free reshape (contiguous dims merge): channels on sublane, pixels on lane.
    x3 = x_nchw.reshape(N, C, HW)
    if hw_pad != HW:
        x3 = jnp.pad(x3, ((0, 0), (0, 0), (0, hw_pad - HW)))

    # Stage-0 weight streams in the input's dtype; later stages contract the f32
    # on-chip intermediate, so their weights stay f32.  The input itself is NOT cast.
    ws = [p["w_folded"].astype(x_nchw.dtype if i == 0 else jnp.float32)
          for i, p in enumerate(params_list)]                           # (Cout, Cin)
    ss = [p["shift"].astype(jnp.float32) for p in params_list]          # (Cout, 1)

    in_specs = [pl.BlockSpec((nb, C, t_hw), lambda n, j: (n, 0, j))]
    for w in ws:
        co, ci = w.shape
        in_specs.append(pl.BlockSpec((co, ci), lambda n, j: (0, 0)))
    for s in ss:
        co = s.shape[0]
        in_specs.append(pl.BlockSpec((co, 1), lambda n, j: (0, 0)))

    kernel = _make_fused_kernel(n_stages, nb, out_dtype)

    out3 = pl.pallas_call(
        kernel,
        out_shape=jax.ShapeDtypeStruct((N, c_last, hw_pad), out_dtype),
        grid_spec=pltpu.PrefetchScalarGridSpec(
            num_scalar_prefetch=0,
            grid=(N // nb, hw_pad // t_hw),
            in_specs=in_specs,
            out_specs=pl.BlockSpec((nb, c_last, t_hw), lambda n, j: (n, 0, j)),
        ),
        compiler_params=pltpu.CompilerParams(
            dimension_semantics=("parallel", "parallel")),
    )(x3, *ws, *ss)

    if hw_pad != HW:
        out3 = out3[:, :, :HW]
    return out3.reshape(N, c_last, H, W)   # free reshape back to NCHW


def make_conv_series_params(key, input_size, output_sizes):
    """Deterministic synthetic parameters mimicking the module's __init__ shapes.

    Returns per-stage dicts holding both the RAW conv/BN parameters (used by the
    unfused reference) and the FOLDED (w_folded, shift) pair consumed by the kernel.
    """
    layer_sizes = [input_size] + list(output_sizes)
    eps = 1e-5
    params = []
    for i in range(1, len(layer_sizes)):
        cin, cout = layer_sizes[i - 1], layer_sizes[i]
        key, k1, k2, k3, k4, k5, k6 = jax.random.split(key, 7)
        w = jax.random.normal(k1, (cout, cin), jnp.float32) * 0.1    # Conv2d weight (k=1)
        b = jax.random.normal(k2, (cout,), jnp.float32) * 0.1        # Conv2d bias
        gamma = 1.0 + 0.1 * jax.random.normal(k3, (cout,), jnp.float32)
        beta = 0.1 * jax.random.normal(k4, (cout,), jnp.float32)
        running_mean = 0.1 * jax.random.normal(k5, (cout,), jnp.float32)
        running_var = 1.0 + 0.1 * jnp.abs(jax.random.normal(k6, (cout,), jnp.float32))

        scale = gamma / jnp.sqrt(running_var + eps)                  # (Cout,)
        params.append(
            dict(
                # raw (reference path)
                w=w, b=b, gamma=gamma, beta=beta,
                running_mean=running_mean, running_var=running_var, eps=eps,
                # folded (kernel path): y = w_folded @ x + shift
                w_folded=scale[:, None] * w,                          # (Cout, Cin)
                shift=(beta - running_mean * scale + b * scale)[:, None],  # (Cout, 1)
            )
        )
    return params


def conv_series_reference(x_nchw, params_list):
    """Plain-JAX eval-mode reference using the RAW (unfolded) parameters."""
    x = x_nchw
    for p in params_list:
        y = jnp.einsum("nchw,oc->nohw", x, p["w"]) + p["b"][None, :, None, None]
        scale = p["gamma"] / jnp.sqrt(p["running_var"] + p["eps"])
        y = (y - p["running_mean"][None, :, None, None]) * scale[None, :, None, None]
        x = y + p["beta"][None, :, None, None]
    return x


if __name__ == "__main__":
    key = jax.random.PRNGKey(0)
    key, kx = jax.random.split(key)

    # ConvSeries(input_size=4, output_sizes=[8, 16], dropout=0.3), eval mode.
    input_size = 4
    output_sizes = [8, 16]
    N, H, W = 2, 16, 16

    x = jax.random.normal(kx, (N, input_size, H, W), jnp.float32)
    params = make_conv_series_params(key, input_size, output_sizes)

    ref = conv_series_reference(x, params)

    # Default path (exact eval-mode semantics; on-chip intermediates stay f32).
    out = jax.block_until_ready(conv_series_forward(x, params))
    assert out.shape == (N, output_sizes[-1], H, W), out.shape
    assert jnp.allclose(out, ref, atol=2e-4, rtol=2e-4), "f32 mismatch vs reference"

    # bf16 OUTPUT path: halves the dominant write stream; compute/accumulate stays f32.
    out_bf16 = jax.block_until_ready(
        conv_series_forward(x, params, out_dtype=jnp.bfloat16))
    assert out_bf16.shape == (N, output_sizes[-1], H, W), out_bf16.shape
    assert jnp.allclose(out_bf16.astype(jnp.float32), ref, atol=3e-2, rtol=3e-2), \
        "bf16-output mismatch vs reference"

    # Odd spatial size -> exercises the lane-padding path (HW % 128 != 0).
    key, kx2 = jax.random.split(key)
    x_odd = jax.random.normal(kx2, (1, input_size, 10, 10), jnp.float32)
    ref_odd = conv_series_reference(x_odd, params)
    out_odd = jax.block_until_ready(conv_series_forward(x_odd, params))
    assert out_odd.shape == ref_odd.shape, out_odd.shape
    assert jnp.allclose(out_odd, ref_odd, atol=2e-4, rtol=2e-4), "padded-HW mismatch"

    print("KERNEL_OK")
</pallas_src>

<mosaic_0001>
module attributes {stable_mosaic.version = 11 : i64} {
  func.func @kernel(%arg0: i32, %arg1: i32, %arg2: memref<1x4x256xf32, #tpu.memory_space<vmem>>, %arg3: memref<8x4xf32, #tpu.memory_space<vmem>>, %arg4: memref<16x8xf32, #tpu.memory_space<vmem>>, %arg5: memref<8x1xf32, #tpu.memory_space<vmem>>, %arg6: memref<16x1xf32, #tpu.memory_space<vmem>>, %arg7: memref<1x16x256xf32, #tpu.memory_space<vmem>>) attributes {dimension_semantics = [#tpu.dimension_semantics<parallel>, #tpu.dimension_semantics<parallel>], iteration_bounds = array<i64: 2, 1>, scalar_prefetch = 0 : i64, scratch_operands = 0 : i64, tpu.core_type = #tpu.core_type<tc>, window_params = [{transform_indices = @transform_0, window_bounds = array<i64: 1, 4, 256>}, {pipeline_mode = #tpu.pipeline_mode<synchronous>, transform_indices = @transform_1, window_bounds = array<i64: 8, 4>}, {pipeline_mode = #tpu.pipeline_mode<synchronous>, transform_indices = @transform_2, window_bounds = array<i64: 16, 8>}, {pipeline_mode = #tpu.pipeline_mode<synchronous>, transform_indices = @transform_3, window_bounds = array<i64: 8, 1>}, {pipeline_mode = #tpu.pipeline_mode<synchronous>, transform_indices = @transform_4, window_bounds = array<i64: 16, 1>}, {transform_indices = @transform_5, window_bounds = array<i64: 1, 16, 256>}]} {
    %c0 = arith.constant 0 : index
    %c0_0 = arith.constant 0 : index
    %c0_1 = arith.constant 0 : index
    %0 = vector.load %arg2[%c0, %c0_0, %c0_1] : memref<1x4x256xf32, #tpu.memory_space<vmem>>, vector<1x4x256xf32>
    %1 = vector.shape_cast %0 : vector<1x4x256xf32> to vector<4x256xf32>
    %c0_2 = arith.constant 0 : index
    %c0_3 = arith.constant 0 : index
    %2 = vector.load %arg3[%c0_2, %c0_3] : memref<8x4xf32, #tpu.memory_space<vmem>>, vector<8x4xf32>
    %cst = arith.constant dense<0.000000e+00> : vector<8x256xf32>
    %3 = tpu.matmul %2, %1, %cst {dimension_numbers = #tpu.dot_dimension_numbers<[1], [0], [0], [1], [0, 0, 1, 1], [], []>} : vector<8x4xf32>, vector<4x256xf32>, vector<8x256xf32> -> vector<8x256xf32>
    %c0_4 = arith.constant 0 : index
    %c0_5 = arith.constant 0 : index
    %4 = vector.load %arg5[%c0_4, %c0_5] : memref<8x1xf32, #tpu.memory_space<vmem>>, vector<8x1xf32>
    %5 = vector.broadcast %4 : vector<8x1xf32> to vector<8x256xf32>
    %6 = arith.addf %3, %5 : vector<8x256xf32>
    %c0_6 = arith.constant 0 : index
    %c0_7 = arith.constant 0 : index
    %7 = vector.load %arg4[%c0_6, %c0_7] : memref<16x8xf32, #tpu.memory_space<vmem>>, vector<16x8xf32>
    %cst_8 = arith.constant dense<0.000000e+00> : vector<16x256xf32>
    %8 = tpu.matmul %7, %6, %cst_8 {dimension_numbers = #tpu.dot_dimension_numbers<[1], [0], [0], [1], [0, 0, 1, 1], [], []>} : vector<16x8xf32>, vector<8x256xf32>, vector<16x256xf32> -> vector<16x256xf32>
    %c0_9 = arith.constant 0 : index
    %c0_10 = arith.constant 0 : index
    %9 = vector.load %arg6[%c0_9, %c0_10] : memref<16x1xf32, #tpu.memory_space<vmem>>, vector<16x1xf32>
    %10 = vector.broadcast %9 : vector<16x1xf32> to vector<16x256xf32>
    %11 = arith.addf %8, %10 : vector<16x256xf32>
    %c0_11 = arith.constant 0 : index
    %c0_12 = arith.constant 0 : index
    %c0_13 = arith.constant 0 : index
    %12 = vector.load %arg7[%c0_11, %c0_12, %c0_13] : memref<1x16x256xf32, #tpu.memory_space<vmem>>, vector<1x16x256xf32>
    %13 = vector.shape_cast %12 : vector<1x16x256xf32> to vector<16x256xf32>
    %14 = vector.shape_cast %11 : vector<16x256xf32> to vector<1x16x256xf32>
    tpu.vector_store %arg7[%c0_11, %c0_12, %c0_13], %14 {strides = array<i32>} : memref<1x16x256xf32, #tpu.memory_space<vmem>>, vector<1x16x256xf32>,
    return
  }
  func.func @transform_0(%arg0: i32, %arg1: i32) -> (i32, i32, i32) {
    %c0_i32 = arith.constant 0 : i32
    %c0_i32_0 = arith.constant 0 : i32
    return %arg0, %c0_i32, %arg1 : i32, i32, i32
  }
  func.func @transform_1(%arg0: i32, %arg1: i32) -> (i32, i32) {
    %c0_i32 = arith.constant 0 : i32
    %c0_i32_0 = arith.constant 0 : i32
    %c0_i32_1 = arith.constant 0 : i32
    return %c0_i32, %c0_i32_0 : i32, i32
  }
  func.func @transform_2(%arg0: i32, %arg1: i32) -> (i32, i32) {
    %c0_i32 = arith.constant 0 : i32
    %c0_i32_0 = arith.constant 0 : i32
    %c0_i32_1 = arith.constant 0 : i32
    return %c0_i32, %c0_i32_0 : i32, i32
  }
  func.func @transform_3(%arg0: i32, %arg1: i32) -> (i32, i32) {
    %c0_i32 = arith.constant 0 : i32
    %c0_i32_0 = arith.constant 0 : i32
    %c0_i32_1 = arith.constant 0 : i32
    return %c0_i32, %c0_i32_0 : i32, i32
  }
  func.func @transform_4(%arg0: i32, %arg1: i32) -> (i32, i32) {
    %c0_i32 = arith.constant 0 : i32
    %c0_i32_0 = arith.constant 0 : i32
    %c0_i32_1 = arith.constant 0 : i32
    return %c0_i32, %c0_i32_0 : i32, i32
  }
  func.func @transform_5(%arg0: i32, %arg1: i32) -> (i32, i32, i32) {
    %c0_i32 = arith.constant 0 : i32
    %c0_i32_0 = arith.constant 0 : i32
    return %arg0, %c0_i32, %arg1 : i32, i32, i32
  }
}

</mosaic_0001>

<bundles_post_ra>
// kernel: conv_series_forward.1
= control target key start
LH: loop header
LB: loop body
LE: loop exit
PB: predicated region body
PF: predicated region fallthrough
CT: control target
= control target key end

     0   :  { %s586_s18 = smov 0   ;;  %s588_s19 = smov 0   ;;  %s641_s0 = inlined_call_operand.vmem [shape: f32[2,4,256], index: 0, kind: input, shape index: {}]   ;;  %s642_s1 = inlined_call_operand.vmem [shape: f32[8,4], index: 1, kind: input, shape index: {}]   ;;  %s643_s2 = inlined_call_operand.vmem [shape: f32[16,8], index: 2, kind: input, shape index: {}]   ;;  %s644_s3 = inlined_call_operand.vmem [shape: f32[8,1], index: 3, kind: input, shape index: {}]   ;;  %s645_s4 = inlined_call_operand.vmem [shape: f32[16,1], index: 4, kind: input, shape index: {}]   ;;  %s646_s5 = inlined_call_operand.vmem [shape: f32[2,16,256], index: 5, kind: output, shape index: {}]  }
   0x1   :  { %s590_s20 = smov 0  }
   0x2 LB: > { %s27_s21 = sadd.s32 1, %s549_s19  ;;  %p487_p0 = scmp.ge.s32.totalorder %s553_s20, 1  ;;  %s553_s20 = sphi %s590_s20, %s15_s20   ;;  %s549_s19 = sphi %s588_s19, %s648_s19   ;;  %s545_s18 = sphi %s586_s18, %s647_s18  }
   0x3   : > { %p29_p1 = scmp.ge.s32.totalorder %s27_s21, 2  ;;  %p208_p2 = scmp.lt.s32.totalorder %s553_s20, 3 }
   0x5   : > { %s650_s21 = smov (%p29_p1, %s27_s21), 0  ;;  %p209_p3 = pnand %p487_p0, %p208_p2 }
   0x6   : > { %p245_p4 = scmp.lt.s32.totalorder (!%p209_p3), %s545_s18, 1 }
   0x7   : > { %212 = sbr.rel (%p209_p3) target bundleno = 298 (0x12a), region = 40 }
   0xc   : > { %v266_v0 = vld [vmem:[%s644_s3] sm:$0xff]  ;;  %v555_v1 = vmov 0   ;;  %s652_s18 = smov (!%p245_p4, %s545_s18), 1  ;;  %vm280_vm0 = vcmask 1043456   ;;  %vm276_vm1 = vcmask 31744   ;;  %v328_v7 = vld [vmem:[%s645_s4 + $0x8] sm:$0xff] }
   0xd   : > { %529 = vset.pattern.permute.xlu0 %v555_v1  ;;  %530 = vset.pattern.permute.xlu1 %v555_v1  ;;  %s502_s24 = sshll.u32 %s652_s18, 3  ;;  %v327_v3 = vld [vmem:[%s645_s4] sm:$0xff]  ;;  %vm339_vm2 = vcmask 64512   ;;  %v326_v14 = vld [vmem:[%s643_s2 + $0x8] sm:$0xff]  ;;  %s503_s13 = sshll.u32 %s652_s18, 5 }
   0xe   : > { %269 = vperm.xlu0 %529, %v266_v0   ;;  %s252_s27 = scalar_lea.vmem %s641_s0, %s502_s24  ;;  %v265_v4 = vld [vmem:[%s642_s1] sm:$0xff]  ;;  %336 = vperm.xlu1 %530, %v328_v7   ;;  %s262_s16 = scalar_lea.vmem %s646_s5, %s503_s13 }
   0xf   : > { %v264_v2 = vld [vmem:[%s252_s27] sm:$0xff] }
  0x10   : > { %273 = vst [vmem:[#allocation1] ss:$2 sm:$0xff] %v264_v2  ;;  %v325_v13 = vld [vmem:[%s643_s2] sm:$0xff] }
  0x16   : > { %331 = vperm.xlu0 %529, %v327_v3  }
  0x17   : > { %v274_v5 = vld.sshfl [vmem:[#allocation1] sm:$0xff pattern:$0x75316420]  ;;  %v275_v6 = vld.sshfl [vmem:[#allocation1 + $0x8] sm:$0xff pattern:$0x75316420] }
  0x18   : > { %492 = vmatpush.msk.msra.mxu0 %vm280_vm0, %v274_v5  ;;  %494 = vmatpush.msk.msra.mxu1 %vm280_vm0, %v275_v6 }
  0x19   : > { %493 = vmatmul.msk.f32.vlgmr.msra.gmra.mxu0 %vm276_vm1, %v265_v4  ;;  %495 = vmatmul.msk.f32.vlgmr.msra.gmra.mxu1 %vm276_vm1, %v265_v4 }
  0x80   : > { %v270_v8 = vpop.permute.xlu0 %269  ;;  %v337_v20 = vpop.permute.xlu1 %336 }
  0x88   : > { %v332_v15 = vpop.permute.xlu0 %331 }
  0x96   : > { %v302_v9 = vpop.f32.mrf.mxu0  ;;  %v322_v10 = vpop.f32.mrf.mxu1 }
  0x97   : > { %v303_v11 = vadd.f32 %v302_v9, %v270_v8  ;;  %v323_v12 = vadd.f32 %v322_v10, %v270_v8 }
  0x99   : > { %361 = vmatpush.msra.mxu2 %v303_v11  ;;  %384 = vmatpush.msra.mxu3 %v323_v12 }
  0x9a   : > { %496 = vmatmul.msk.f32.vlgmr.msra.gmra.mxu2 %vm339_vm2, %v325_v13  ;;  %498 = vmatmul.msk.f32.vlgmr.msra.gmra.mxu3 %vm339_vm2, %v325_v13 }
  0xa2   : > { %497 = vmatmul.msk.f32.gmra.mxu2 %vm339_vm2, %v326_v14  ;;  %499 = vmatmul.msk.f32.gmra.mxu3 %vm339_vm2, %v326_v14 }
 0x11d   : > { %v363_v16 = vpop.f32.mrf.mxu2  ;;  %v386_v17 = vpop.f32.mrf.mxu3 }
 0x11e   : > { %v364_v18 = vadd.f32 %v363_v16, %v332_v15  ;;  %v387_v19 = vadd.f32 %v386_v17, %v332_v15 }
 0x120   : > { %392 = vst [vmem:[%s262_s16] sm:$0xff] %v364_v18 }
 0x121   : > { %393 = vst [vmem:[%s262_s16 + $0x8] sm:$0xff] %v387_v19 }
 0x125   : > { %v366_v21 = vpop.f32.mrf.mxu2  ;;  %v389_v22 = vpop.f32.mrf.mxu3 }
 0x126   : > { %v367_v23 = vadd.f32 %v366_v21, %v337_v20  ;;  %v390_v24 = vadd.f32 %v389_v22, %v337_v20 }
 0x128   : > { %394 = vst [vmem:[%s262_s16 + $0x10] sm:$0xff] %v367_v23 }
 0x129   : > { %395 = vst [vmem:[%s262_s16 + $0x18] sm:$0xff] %v390_v24 }
 0x12a PF: > { %s15_s20 = sadd.s32 1, %s553_s20   ;;  %s647_s18 = smov %s549_s19 }
 0x12b   : > { %p12_p5 = scmp.ge.s32.totalorder %s15_s20, 4   ;;  %s648_s19 = smov %s650_s21 }
 0x12d   :  { %14 = sbr.rel (!%p12_p5) target bundleno = 2 (0x2), region = 70 }

</bundles_post_ra>
